<compile_context>
chip_gen: v6e
topology: v6e:2x2x1
jax: 0.10.0
libtpu: 0.0.40
codegen_flags: <defaults>
</compile_context>

<pallas_src>
import jax
import jax.numpy as jnp
from jax.experimental import pallas as pl
from jax.experimental.pallas import tpu as pltpu


# ----------------------------------------------------------------------------
# Deterministic parameter construction (shapes implied by __init__).
# NOT used by forward() (identity) — kept only to document the module.
# ----------------------------------------------------------------------------
def build_params():
    params = {
        # ExampleDuplicateModel
        "param1": jnp.ones((1,), jnp.float32),
        "conv1_w": jnp.full((4, 3, 1, 1), 0.01, jnp.float32),   # Conv2d(3,4,k=1,bias=False)
        "conv2_w": jnp.full((2, 4, 1, 1), 0.02, jnp.float32),   # Conv2d(4,2,k=1)
        "conv2_b": jnp.zeros((2,), jnp.float32),
        "bn_gamma": jnp.ones((2,), jnp.float32),                # BatchNorm2d(2)
        "bn_beta": jnp.zeros((2,), jnp.float32),
        # SubModel
        "sub_conv1_w": jnp.full((2, 1, 1, 1), 0.03, jnp.float32),  # Conv2d(2,2,k=1,groups=2)
        "sub_conv1_b": jnp.zeros((2,), jnp.float32),
        "sub_gn_gamma": jnp.ones((2,), jnp.float32),            # GroupNorm(2,2)
        "sub_gn_beta": jnp.zeros((2,), jnp.float32),
        "sub_param1": jnp.ones((1,), jnp.float32),
    }
    # conv3 shares conv1's weight (self.conv3[0] = self.conv1[0])
    params["conv3_w"] = params["conv1_w"]
    return params


# ----------------------------------------------------------------------------
# Pallas identity kernel (the full forward-pass compute of this module).
# ----------------------------------------------------------------------------
_LANE = 128
_MAX_LANES = 1024                      # widest lane-dense minor dim we try
_MAX_BLOCK_BYTES = 4 * 1024 * 1024     # keeps 2x double-buffered (in+out) <= 16 MiB


def _copy_kernel(x_ref, o_ref):
    o_ref[...] = x_ref[...]


def _choose_2d_layout(total, last_dim):
    """Flatten to (rows, lanes) with lanes a large multiple of 128 when possible."""
    if total % _LANE == 0:
        lanes = _LANE
        while lanes * 2 <= _MAX_LANES and total % (lanes * 2) == 0:
            lanes *= 2
    else:
        # Fallback: keep the original minor dim on lanes (partial-lane stores).
        lanes = last_dim
    return total // lanes, lanes


def _choose_block_rows(rows, lanes, itemsize):
    """Pick a row-tile: multiple of 8, evenly divides rows, <= _MAX_BLOCK_BYTES."""
    max_rows = max(8, _MAX_BLOCK_BYTES // (lanes * itemsize))
    max_rows -= max_rows % 8
    if rows <= max_rows:
        return rows                     # full-extent block (always legal)
    block_rows = max_rows
    while block_rows >= 8 and rows % block_rows != 0:
        block_rows -= 8
    if block_rows < 8:
        # TODO(synk): ragged row counts fall back to one full-extent block.
        return rows
    return block_rows


@jax.jit
def example_duplicate_model_forward(x):
    """Identity forward of ExampleDuplicateModel via an aliased Pallas copy kernel."""
    orig_shape = x.shape
    total = x.size
    rows, lanes = _choose_2d_layout(total, orig_shape[-1])
    x2d = x.reshape(rows, lanes)
    block_rows = _choose_block_rows(rows, lanes, x2d.dtype.itemsize)
    grid = (rows // block_rows,)

    out2d = pl.pallas_call(
        _copy_kernel,
        out_shape=jax.ShapeDtypeStruct((rows, lanes), x2d.dtype),
        grid_spec=pl.GridSpec(
            grid=grid,
            in_specs=[pl.BlockSpec((block_rows, lanes), lambda i: (i, 0))],
            out_specs=pl.BlockSpec((block_rows, lanes), lambda i: (i, 0)),
        ),
        # The forward is an identity: write the result back into the input's
        # HBM buffer instead of allocating (and filling) a second array.
        input_output_aliases={0: 0},
        compiler_params=pltpu.CompilerParams(
            dimension_semantics=("parallel",),      # megacore shard on v7x
            vmem_limit_bytes=32 * 1024 * 1024,      # fits v7x's 64 MiB VMEM
        ),
    )(x2d)
    return out2d.reshape(orig_shape)


if __name__ == "__main__":
    key = jax.random.PRNGKey(0)
    # Batch=2, channels=3 (conv1 expects 3 in-channels), spatial 16x16.
    x = jax.random.normal(key, (2, 3, 16, 16), dtype=jnp.float32)

    _params = build_params()  # parameters exist but are unused by forward()

    y = example_duplicate_model_forward(x)
    y = jax.block_until_ready(y)

    assert y.shape == x.shape and y.dtype == x.dtype
    assert bool(jnp.array_equal(y, x))
    print("KERNEL_OK")
</pallas_src>

<mosaic_0001>
module attributes {stable_mosaic.version = 11 : i64} {
  func.func @_copy_kernel(%arg0: i32, %arg1: memref<3x512xf32, #tpu.memory_space<vmem>>, %arg2: memref<3x512xf32, #tpu.memory_space<vmem>>) attributes {dimension_semantics = [#tpu.dimension_semantics<parallel>], iteration_bounds = array<i64: 1>, scalar_prefetch = 0 : i64, scratch_operands = 0 : i64, tpu.core_type = #tpu.core_type<tc>, window_params = [{transform_indices = @transform_0, window_bounds = array<i64: 3, 512>}, {transform_indices = @transform_1, window_bounds = array<i64: 3, 512>}]} {
    %c0 = arith.constant 0 : index
    %c0_0 = arith.constant 0 : index
    %0 = vector.load %arg1[%c0, %c0_0] : memref<3x512xf32, #tpu.memory_space<vmem>>, vector<3x512xf32>
    %c0_1 = arith.constant 0 : index
    %c0_2 = arith.constant 0 : index
    %1 = vector.load %arg2[%c0_1, %c0_2] : memref<3x512xf32, #tpu.memory_space<vmem>>, vector<3x512xf32>
    tpu.vector_store %arg2[%c0_1, %c0_2], %0 {strides = array<i32>} : memref<3x512xf32, #tpu.memory_space<vmem>>, vector<3x512xf32>,
    return
  }
  func.func @transform_0(%arg0: i32) -> (i32, i32) {
    %c0_i32 = arith.constant 0 : i32
    %c0_i32_0 = arith.constant 0 : i32
    return %arg0, %c0_i32 : i32, i32
  }
  func.func @transform_1(%arg0: i32) -> (i32, i32) {
    %c0_i32 = arith.constant 0 : i32
    %c0_i32_0 = arith.constant 0 : i32
    return %arg0, %c0_i32 : i32, i32
  }
}

</mosaic_0001>

<bundles_post_ra>
// kernel: example_duplicate_model_forward.1
= control target key start
LH: loop header
LB: loop body
LE: loop exit
PB: predicated region body
PF: predicated region fallthrough
CT: control target
= control target key end

     0   :  { %s38_s0 = inlined_call_operand.vmem [shape: f32[3,512], index: 0, kind: input, shape index: {}, may-alias: {0,1}]   ;;  %s39_s1 = inlined_call_operand.vmem [shape: f32[3,512], index: 1, kind: output, shape index: {}, may-alias: {0,1}]  }
   0x1   :  { %v8_v0 = vld [vmem:[%s38_s0] sm:$0x77]  ;;  %v9_v1 = vld [vmem:[%s38_s0 + $0x8] sm:$0x77] }
   0x2   :  { %10 = vst [vmem:[%s39_s1] sm:$0x77] %v8_v0  ;;  %11 = vst [vmem:[%s39_s1 + $0x8] sm:$0x77] %v9_v1 }

</bundles_post_ra>
